<compile_context>
chip_gen: v5e
topology: v5e:2x2
jax: 0.10.0
libtpu: 0.0.40
codegen_flags: <defaults>
</compile_context>

<pallas_src>
import jax
import jax.numpy as jnp
from jax.experimental import pallas as pl
from jax.experimental.pallas import tpu as pltpu

LANE = 128


def _round_up(x, m):
    return (x + m - 1) // m * m


def _choose_tile(batch, block_b):
    """Batch tile: multiple of 8, as large as possible subject to
       (a) tb <= block_b, (b) grid >= 2 when the batch allows it (v7x megacore),
       (c) padding waste <= ~10% of the batch (or <= 8 rows)."""
    b8 = _round_up(batch, 8)
    cap = min(_round_up(block_b, 8), b8)
    if b8 >= 16:                                     # keep both v7x TensorCores busy
        cap = min(cap, _round_up((b8 + 1) // 2, 8))
    best = 8
    for tb in range(8, cap + 1, 8):
        waste = _round_up(b8, tb) - b8
        if waste <= max(b8 // 10, 8):
            best = tb                                # scanned ascending -> largest wins
    return best


def _critic_kernel(sa_ref, w1_ref, b1_ref, w2a_ref, w2b_ref, b2a_ref, b2b_ref,
                   w3_ref, b3_ref, q1_ref, q2_ref):
    bf16 = jnp.bfloat16
    hp = w2a_ref.shape[0]

    # Layer 1: single K=in_dim matmul against the packed (in_dim, 2*Hp) bf16
    # weight (both heads fused).  MXU in bf16, f32 accumulation.
    sa = sa_ref[...].astype(bf16)
    h1 = jnp.dot(sa, w1_ref[...], preferred_element_type=jnp.float32)
    h1 = jnp.maximum(h1 + b1_ref[...], 0.0)          # bias + ReLU in f32 (VPU)

    # Lane-aligned split (Hp is a multiple of 128) -> no copies / lane shuffles.
    h1a = h1[:, :hp].astype(bf16)
    h1b = h1[:, hp:].astype(bf16)

    # Layer 2: one (Hp x Hp) matmul per head, bf16 weights resident in VMEM.
    h2a = jnp.dot(h1a, w2a_ref[...], preferred_element_type=jnp.float32)
    h2a = jnp.maximum(h2a + b2a_ref[...], 0.0)
    h2b = jnp.dot(h1b, w2b_ref[...], preferred_element_type=jnp.float32)
    h2b = jnp.maximum(h2b + b2b_ref[...], 0.0)

    # Layer 3 (Hp -> 1): VPU multiply + XLU lane reduce; keeps the MXU free
    # (an N=1 matmul would burn a full 128-wide MXU output tile).
    w3 = w3_ref[...]                                 # (2, Hp) f32; row 0 = q1, row 1 = q2
    q1_ref[...] = jnp.sum(h2a * w3[0:1, :], axis=-1, keepdims=True) + b3_ref[0]
    q2_ref[...] = jnp.sum(h2b * w3[1:2, :], axis=-1, keepdims=True) + b3_ref[1]


def simple_critic_forward(state, action, kparams, *, block_b=1024):
    """Both Q heads in one tiled Pallas kernel.  Returns (q1, q2), each (B, 1) f32.
       `kparams` must come from prepare_critic_params()."""
    state = state.astype(jnp.float32)
    action = action.astype(jnp.float32)
    batch = state.shape[0]

    # One (B, in_dim) operand for layer 1 (single K=in_dim MXU pass in-kernel).
    sa = jnp.concatenate([state, action], axis=-1)
    in_dim = sa.shape[1]
    hp = kparams["w2a"].shape[0]

    tb = _choose_tile(batch, block_b)
    bp = _round_up(batch, tb)
    if bp != batch:
        sa = jnp.pad(sa, ((0, bp - batch), (0, 0)))

    grid = (bp // tb,)

    def resident(arr):
        # Full-array block + constant index_map -> stays VMEM-resident across steps.
        return pl.BlockSpec(arr.shape, lambda i: (0,) * arr.ndim)

    args = (sa, kparams["w1"], kparams["b1"],
            kparams["w2a"], kparams["w2b"], kparams["b2a"], kparams["b2b"],
            kparams["w3"], kparams["b3"])

    in_specs = ([pl.BlockSpec((tb, in_dim), lambda i: (i, 0))]         # streamed tile
                + [resident(a) for a in args[1:-1]]                    # resident weights
                + [pl.BlockSpec(memory_space=pltpu.MemorySpace.SMEM)]) # b3 scalars

    out_specs = (pl.BlockSpec((tb, 1), lambda i: (i, 0)),
                 pl.BlockSpec((tb, 1), lambda i: (i, 0)))
    out_shape = (jax.ShapeDtypeStruct((bp, 1), jnp.float32),
                 jax.ShapeDtypeStruct((bp, 1), jnp.float32))

    flops = 2 * bp * (in_dim * 2 * hp + 2 * hp * hp + 2 * hp)
    bytes_accessed = (bp * (in_dim + 2) * 4
                      + sum(int(a.size) * a.dtype.itemsize for a in args[1:]))
    cost = pl.CostEstimate(flops=flops, transcendentals=0,
                           bytes_accessed=bytes_accessed)

    q1, q2 = pl.pallas_call(
        _critic_kernel,
        grid=grid,
        in_specs=in_specs,
        out_specs=out_specs,
        out_shape=out_shape,
        compiler_params=pltpu.CompilerParams(
            dimension_semantics=("parallel",),
            vmem_limit_bytes=32 * 1024 * 1024),
        cost_estimate=cost,
    )(*args)

    return q1[:batch], q2[:batch]


def init_simple_critic_params(key, state_dim, action_dim, hidden_dim=256):
    """PyTorch-style init: each Linear uses U(-1/sqrt(fan_in), 1/sqrt(fan_in)) for
       weight and bias.  Layout mirrors the torch module (per-head dicts, f32)."""
    in_dim = state_dim + action_dim

    def linear(k, fan_in, fan_out):
        kw, kb = jax.random.split(k)
        bound = 1.0 / jnp.sqrt(float(fan_in))
        w = jax.random.uniform(kw, (fan_in, fan_out), jnp.float32, -bound, bound)
        b = jax.random.uniform(kb, (1, fan_out), jnp.float32, -bound, bound)
        return w, b

    keys = jax.random.split(key, 6)

    def head(k1, k2, k3):
        w1, b1 = linear(k1, in_dim, hidden_dim)
        w2, b2 = linear(k2, hidden_dim, hidden_dim)
        w3, b3 = linear(k3, hidden_dim, 1)
        return {"w1": w1, "b1": b1, "w2": w2, "b2": b2, "w3": w3, "b3": b3}

    return {"q1": head(*keys[:3]), "q2": head(*keys[3:])}


def prepare_critic_params(params):
    """One-time packing into the kernel layout:
       * hidden dim zero-padded to a multiple of 128 (lane-aligned h1 split),
       * matmul weights cast to bf16 (no per-step casts, half the resident VMEM),
       * W1 packed (in_dim, 2*Hp) across both heads, W3 as (2, Hp) f32 rows,
       * biases f32; b3 stored as two SMEM scalars.
       Zero padding is exact: padded h1/h2 columns are ReLU(0)=0 and contribute 0."""
    q1, q2 = params["q1"], params["q2"]
    h = q1["w2"].shape[0]
    hp = max(_round_up(h, LANE), LANE)
    ph = hp - h

    def padw(w, r, c):
        return jnp.pad(w, ((0, r), (0, c)))

    w1 = jnp.concatenate([padw(q1["w1"], 0, ph), padw(q2["w1"], 0, ph)],
                         axis=1).astype(jnp.bfloat16)               # (in_dim, 2*Hp)
    b1 = jnp.concatenate([padw(q1["b1"], 0, ph), padw(q2["b1"], 0, ph)], axis=1)
    w2a = padw(q1["w2"], ph, ph).astype(jnp.bfloat16)               # (Hp, Hp)
    w2b = padw(q2["w2"], ph, ph).astype(jnp.bfloat16)
    b2a = padw(q1["b2"], 0, ph)                                     # (1, Hp) f32
    b2b = padw(q2["b2"], 0, ph)
    w3 = jnp.concatenate([padw(q1["w3"].T, 0, ph),
                          padw(q2["w3"].T, 0, ph)], axis=0)         # (2, Hp) f32
    b3 = jnp.concatenate([q1["b3"].reshape(1), q2["b3"].reshape(1)])  # (2,) f32

    return {"w1": w1, "b1": b1, "w2a": w2a, "w2b": w2b,
            "b2a": b2a, "b2b": b2b, "w3": w3, "b3": b3}


def _reference_forward(state, action, params):
    """Pure-JAX f32 reference matching the PyTorch module semantics."""
    sa = jnp.concatenate([state, action], axis=-1)

    def head(p):
        h1 = jnp.maximum(sa @ p["w1"] + p["b1"], 0.0)
        h2 = jnp.maximum(h1 @ p["w2"] + p["b2"], 0.0)
        return h2 @ p["w3"] + p["b3"]

    return head(params["q1"]), head(params["q2"])


if __name__ == "__main__":
    key = jax.random.PRNGKey(0)
    k_state, k_action, k_params = jax.random.split(key, 3)

    batch, state_dim, action_dim, hidden_dim = 2, 8, 4, 32

    state = jax.random.normal(k_state, (batch, state_dim), jnp.float32)
    action = jax.random.normal(k_action, (batch, action_dim), jnp.float32)
    params = init_simple_critic_params(k_params, state_dim, action_dim, hidden_dim)
    kparams = prepare_critic_params(params)

    q1, q2 = simple_critic_forward(state, action, kparams)
    jax.block_until_ready((q1, q2))

    r1, r2 = _reference_forward(state, action, params)
    assert q1.shape == (batch, 1) and q2.shape == (batch, 1)
    # bf16 MXU weights (f32 accumulation) vs. the f32 reference -> ~1e-2-level deltas.
    assert jnp.allclose(q1, r1, atol=5e-2, rtol=5e-2), (q1, r1)
    assert jnp.allclose(q2, r2, atol=5e-2, rtol=5e-2), (q2, r2)

    print("KERNEL_OK")
</pallas_src>

<mosaic_0001>
module attributes {stable_mosaic.version = 11 : i64} {
  func.func @_critic_kernel(%arg0: i32, %arg1: memref<8x12xf32, #tpu.memory_space<vmem>>, %arg2: memref<12x256xbf16, #tpu.memory_space<vmem>>, %arg3: memref<1x256xf32, #tpu.memory_space<vmem>>, %arg4: memref<128x128xbf16, #tpu.memory_space<vmem>>, %arg5: memref<128x128xbf16, #tpu.memory_space<vmem>>, %arg6: memref<1x128xf32, #tpu.memory_space<vmem>>, %arg7: memref<1x128xf32, #tpu.memory_space<vmem>>, %arg8: memref<2x128xf32, #tpu.memory_space<vmem>>, %arg9: memref<2xf32, #tpu.memory_space<smem>>, %arg10: memref<8x1xf32, #tpu.memory_space<vmem>>, %arg11: memref<8x1xf32, #tpu.memory_space<vmem>>) attributes {dimension_semantics = [#tpu.dimension_semantics<parallel>], iteration_bounds = array<i64: 1>, scalar_prefetch = 0 : i64, scratch_operands = 0 : i64, tpu.core_type = #tpu.core_type<tc>, window_params = [{transform_indices = @transform_0, window_bounds = array<i64: 8, 12>}, {pipeline_mode = #tpu.pipeline_mode<synchronous>, transform_indices = @transform_1, window_bounds = array<i64: 12, 256>}, {pipeline_mode = #tpu.pipeline_mode<synchronous>, transform_indices = @transform_2, window_bounds = array<i64: 1, 256>}, {pipeline_mode = #tpu.pipeline_mode<synchronous>, transform_indices = @transform_3, window_bounds = array<i64: 128, 128>}, {pipeline_mode = #tpu.pipeline_mode<synchronous>, transform_indices = @transform_4, window_bounds = array<i64: 128, 128>}, {pipeline_mode = #tpu.pipeline_mode<synchronous>, transform_indices = @transform_5, window_bounds = array<i64: 1, 128>}, {pipeline_mode = #tpu.pipeline_mode<synchronous>, transform_indices = @transform_6, window_bounds = array<i64: 1, 128>}, {pipeline_mode = #tpu.pipeline_mode<synchronous>, transform_indices = @transform_7, window_bounds = array<i64: 2, 128>}, {transform_indices = @transform_8, window_bounds = array<i64: 2>}, {transform_indices = @transform_9, window_bounds = array<i64: 8, 1>}, {transform_indices = @transform_10, window_bounds = array<i64: 8, 1>}]} {
    %c0 = arith.constant 0 : index
    %c0_0 = arith.constant 0 : index
    %0 = vector.load %arg1[%c0, %c0_0] : memref<8x12xf32, #tpu.memory_space<vmem>>, vector<8x12xf32>
    %1 = arith.truncf %0 : vector<8x12xf32> to vector<8x12xbf16>
    %c0_1 = arith.constant 0 : index
    %c0_2 = arith.constant 0 : index
    %2 = vector.load %arg2[%c0_1, %c0_2] : memref<12x256xbf16, #tpu.memory_space<vmem>>, vector<12x256xbf16>
    %cst = arith.constant dense<0.000000e+00> : vector<8x256xf32>
    %3 = tpu.matmul %1, %2, %cst {dimension_numbers = #tpu.dot_dimension_numbers<[1], [0], [0], [1], [0, 0, 1, 1], [], []>} : vector<8x12xbf16>, vector<12x256xbf16>, vector<8x256xf32> -> vector<8x256xf32>
    %c0_3 = arith.constant 0 : index
    %c0_4 = arith.constant 0 : index
    %4 = vector.load %arg3[%c0_3, %c0_4] : memref<1x256xf32, #tpu.memory_space<vmem>>, vector<1x256xf32>
    %5 = vector.broadcast %4 : vector<1x256xf32> to vector<8x256xf32>
    %6 = arith.addf %3, %5 : vector<8x256xf32>
    %cst_5 = arith.constant 0.000000e+00 : f32
    %7 = vector.broadcast %cst_5 : f32 to vector<8x256xf32>
    %8 = arith.maximumf %6, %7 : vector<8x256xf32>
    %9 = vector.extract_strided_slice %8 {offsets = [0, 0], sizes = [8, 128], strides = [1, 1]} : vector<8x256xf32> to vector<8x128xf32>
    %10 = arith.truncf %9 : vector<8x128xf32> to vector<8x128xbf16>
    %11 = vector.extract_strided_slice %8 {offsets = [0, 128], sizes = [8, 128], strides = [1, 1]} : vector<8x256xf32> to vector<8x128xf32>
    %12 = arith.truncf %11 : vector<8x128xf32> to vector<8x128xbf16>
    %c0_6 = arith.constant 0 : index
    %c0_7 = arith.constant 0 : index
    %13 = vector.load %arg4[%c0_6, %c0_7] : memref<128x128xbf16, #tpu.memory_space<vmem>>, vector<128x128xbf16>
    %cst_8 = arith.constant dense<0.000000e+00> : vector<8x128xf32>
    %14 = tpu.matmul %10, %13, %cst_8 {dimension_numbers = #tpu.dot_dimension_numbers<[1], [0], [0], [1], [0, 0, 1, 1], [], []>} : vector<8x128xbf16>, vector<128x128xbf16>, vector<8x128xf32> -> vector<8x128xf32>
    %c0_9 = arith.constant 0 : index
    %c0_10 = arith.constant 0 : index
    %15 = vector.load %arg6[%c0_9, %c0_10] : memref<1x128xf32, #tpu.memory_space<vmem>>, vector<1x128xf32>
    %16 = vector.broadcast %15 : vector<1x128xf32> to vector<8x128xf32>
    %17 = arith.addf %14, %16 : vector<8x128xf32>
    %cst_11 = arith.constant 0.000000e+00 : f32
    %18 = vector.broadcast %cst_11 : f32 to vector<8x128xf32>
    %19 = arith.maximumf %17, %18 : vector<8x128xf32>
    %c0_12 = arith.constant 0 : index
    %c0_13 = arith.constant 0 : index
    %20 = vector.load %arg5[%c0_12, %c0_13] : memref<128x128xbf16, #tpu.memory_space<vmem>>, vector<128x128xbf16>
    %cst_14 = arith.constant dense<0.000000e+00> : vector<8x128xf32>
    %21 = tpu.matmul %12, %20, %cst_14 {dimension_numbers = #tpu.dot_dimension_numbers<[1], [0], [0], [1], [0, 0, 1, 1], [], []>} : vector<8x128xbf16>, vector<128x128xbf16>, vector<8x128xf32> -> vector<8x128xf32>
    %c0_15 = arith.constant 0 : index
    %c0_16 = arith.constant 0 : index
    %22 = vector.load %arg7[%c0_15, %c0_16] : memref<1x128xf32, #tpu.memory_space<vmem>>, vector<1x128xf32>
    %23 = vector.broadcast %22 : vector<1x128xf32> to vector<8x128xf32>
    %24 = arith.addf %21, %23 : vector<8x128xf32>
    %cst_17 = arith.constant 0.000000e+00 : f32
    %25 = vector.broadcast %cst_17 : f32 to vector<8x128xf32>
    %26 = arith.maximumf %24, %25 : vector<8x128xf32>
    %c0_18 = arith.constant 0 : index
    %c0_19 = arith.constant 0 : index
    %27 = vector.load %arg8[%c0_18, %c0_19] : memref<2x128xf32, #tpu.memory_space<vmem>>, vector<2x128xf32>
    %28 = vector.extract_strided_slice %27 {offsets = [0, 0], sizes = [1, 128], strides = [1, 1]} : vector<2x128xf32> to vector<1x128xf32>
    %29 = vector.broadcast %28 : vector<1x128xf32> to vector<8x128xf32>
    %30 = arith.mulf %19, %29 : vector<8x128xf32>
    %cst_20 = arith.constant dense<0.000000e+00> : vector<8xf32>
    %31 = vector.multi_reduction <add>, %30, %cst_20 [1] : vector<8x128xf32> to vector<8xf32>
    %32 = vector.shape_cast %31 : vector<8xf32> to vector<8x1xf32>
    %c0_21 = arith.constant 0 : index
    %33 = memref.load %arg9[%c0_21] : memref<2xf32, #tpu.memory_space<smem>>
    %34 = vector.broadcast %33 : f32 to vector<8x1xf32>
    %35 = arith.addf %32, %34 : vector<8x1xf32>
    %c0_22 = arith.constant 0 : index
    %c0_23 = arith.constant 0 : index
    %36 = vector.load %arg10[%c0_22, %c0_23] : memref<8x1xf32, #tpu.memory_space<vmem>>, vector<8x1xf32>
    tpu.vector_store %arg10[%c0_22, %c0_23], %35 {strides = array<i32>} : memref<8x1xf32, #tpu.memory_space<vmem>>, vector<8x1xf32>,
    %37 = vector.extract_strided_slice %27 {offsets = [1, 0], sizes = [1, 128], strides = [1, 1]} : vector<2x128xf32> to vector<1x128xf32>
    %38 = vector.broadcast %37 : vector<1x128xf32> to vector<8x128xf32>
    %39 = arith.mulf %26, %38 : vector<8x128xf32>
    %cst_24 = arith.constant dense<0.000000e+00> : vector<8xf32>
    %40 = vector.multi_reduction <add>, %39, %cst_24 [1] : vector<8x128xf32> to vector<8xf32>
    %41 = vector.shape_cast %40 : vector<8xf32> to vector<8x1xf32>
    %c1 = arith.constant 1 : index
    %42 = memref.load %arg9[%c1] : memref<2xf32, #tpu.memory_space<smem>>
    %43 = vector.broadcast %42 : f32 to vector<8x1xf32>
    %44 = arith.addf %41, %43 : vector<8x1xf32>
    %c0_25 = arith.constant 0 : index
    %c0_26 = arith.constant 0 : index
    %45 = vector.load %arg11[%c0_25, %c0_26] : memref<8x1xf32, #tpu.memory_space<vmem>>, vector<8x1xf32>
    tpu.vector_store %arg11[%c0_25, %c0_26], %44 {strides = array<i32>} : memref<8x1xf32, #tpu.memory_space<vmem>>, vector<8x1xf32>,
    return
  }
  func.func @transform_0(%arg0: i32) -> (i32, i32) {
    %c0_i32 = arith.constant 0 : i32
    %c0_i32_0 = arith.constant 0 : i32
    return %arg0, %c0_i32 : i32, i32
  }
  func.func @transform_1(%arg0: i32) -> (i32, i32) {
    %c0_i32 = arith.constant 0 : i32
    %c0_i32_0 = arith.constant 0 : i32
    %c0_i32_1 = arith.constant 0 : i32
    return %c0_i32, %c0_i32_0 : i32, i32
  }
  func.func @transform_2(%arg0: i32) -> (i32, i32) {
    %c0_i32 = arith.constant 0 : i32
    %c0_i32_0 = arith.constant 0 : i32
    %c0_i32_1 = arith.constant 0 : i32
    return %c0_i32, %c0_i32_0 : i32, i32
  }
  func.func @transform_3(%arg0: i32) -> (i32, i32) {
    %c0_i32 = arith.constant 0 : i32
    %c0_i32_0 = arith.constant 0 : i32
    %c0_i32_1 = arith.constant 0 : i32
    return %c0_i32, %c0_i32_0 : i32, i32
  }
  func.func @transform_4(%arg0: i32) -> (i32, i32) {
    %c0_i32 = arith.constant 0 : i32
    %c0_i32_0 = arith.constant 0 : i32
    %c0_i32_1 = arith.constant 0 : i32
    return %c0_i32, %c0_i32_0 : i32, i32
  }
  func.func @transform_5(%arg0: i32) -> (i32, i32) {
    %c0_i32 = arith.constant 0 : i32
    %c0_i32_0 = arith.constant 0 : i32
    %c0_i32_1 = arith.constant 0 : i32
    return %c0_i32, %c0_i32_0 : i32, i32
  }
  func.func @transform_6(%arg0: i32) -> (i32, i32) {
    %c0_i32 = arith.constant 0 : i32
    %c0_i32_0 = arith.constant 0 : i32
    %c0_i32_1 = arith.constant 0 : i32
    return %c0_i32, %c0_i32_0 : i32, i32
  }
  func.func @transform_7(%arg0: i32) -> (i32, i32) {
    %c0_i32 = arith.constant 0 : i32
    %c0_i32_0 = arith.constant 0 : i32
    %c0_i32_1 = arith.constant 0 : i32
    return %c0_i32, %c0_i32_0 : i32, i32
  }
  func.func @transform_8(%arg0: i32) -> i32 {
    %c0_i32 = arith.constant 0 : i32
    %c0_i32_0 = arith.constant 0 : i32
    return %c0_i32 : i32
  }
  func.func @transform_9(%arg0: i32) -> (i32, i32) {
    %c0_i32 = arith.constant 0 : i32
    %c0_i32_0 = arith.constant 0 : i32
    return %arg0, %c0_i32 : i32, i32
  }
  func.func @transform_10(%arg0: i32) -> (i32, i32) {
    %c0_i32 = arith.constant 0 : i32
    %c0_i32_0 = arith.constant 0 : i32
    return %arg0, %c0_i32 : i32, i32
  }
}

</mosaic_0001>

<bundles_post_ra>
// kernel: tpu_custom_call.1
= control target key start
LH: loop header
LB: loop body
LE: loop exit
PB: predicated region body
PF: predicated region fallthrough
CT: control target
= control target key end

     0   :  { %16 = vsyncpa [#allocation3], 0  ;;  %s718_s0 = inlined_call_operand.hbm [shape: f32[8,12], index: 0, kind: input, shape index: {}]   ;;  %s719_s1 = inlined_call_operand.hbm [shape: bf16[12,256], index: 1, kind: input, shape index: {}]   ;;  %s720_s2 = inlined_call_operand.hbm [shape: f32[1,256], index: 2, kind: input, shape index: {}]   ;;  %s721_s3 = inlined_call_operand.hbm [shape: bf16[128,128], index: 3, kind: input, shape index: {}]   ;;  %s722_s4 = inlined_call_operand.hbm [shape: bf16[128,128], index: 4, kind: input, shape index: {}]   ;;  %s723_s5 = inlined_call_operand.vmem [shape: f32[1,128], index: 5, kind: input, shape index: {}]   ;;  %s724_s6 = inlined_call_operand.vmem [shape: f32[1,128], index: 6, kind: input, shape index: {}]   ;;  %s725_s7 = inlined_call_operand.vmem [shape: f32[2,128], index: 7, kind: input, shape index: {}]   ;;  %s726_s8 = inlined_call_operand.vmem [shape: f32[2], index: 8, kind: input, shape index: {}]   ;;  %s727_s9 = inlined_call_operand.vmem [shape: f32[8,1], index: 9, kind: output, shape index: {0}]   ;;  %s728_s10 = inlined_call_operand.vmem [shape: f32[8,1], index: 10, kind: output, shape index: {1}]  }
   0x1   :  { %17 = vsyncpa [#allocation6], 0 }
   0x2   :  { %18 = vsyncpa [#allocation9], 0  ;;  %s35_s15 = sshll.u32 %s719_s1, 4  ;;  %s36_s15 = int_to_ptr.hbm [resolvable:$true] %s35_s15 }
   0x3   :  { %19 = vsyncpa [#allocation4], 0  ;;  %s620_s16 = smov [#allocation5]   ;;  %s59_s20 = sshll.u32 %s721_s3, 4  ;;  %s60_s20 = int_to_ptr.hbm [resolvable:$true] %s59_s20 }
   0x4   :  { %s37_s17 = sshll.u32 %s620_s16, 4  ;;  %s621_s21 = smov 128   ;;  %s38_s17 = int_to_ptr.vmem [resolvable:$true] %s37_s17 }
   0x5   :  { %s622_s22 = smov 8   ;;  %s623_s23 = smov [#allocation8]  }
   0x6   :  { %43 = dma.hbm_to_vmem [thread:$0]  %s36_s15, 256, %s38_s17, [#allocation6], %s621_s21, %s621_s21, %s622_s22  }
   0x7   :  { %s61_s24 = sshll.u32 %s623_s23, 4  ;;  %s624_s25 = smov 64   ;;  %s62_s24 = int_to_ptr.vmem [resolvable:$true] %s61_s24 }
   0x8   :  { %s625_s26 = smov 4   ;;  %s25_s28 = sshll.u32 %s718_s0, 4  ;;  %s26_s28 = int_to_ptr.hbm [resolvable:$true] %s25_s28 }
   0x9   :  { %67 = dma.hbm_to_vmem [thread:$0]  %s60_s20, 1024, %s62_s24, [#allocation9], %s624_s25, %s624_s25, %s625_s26  }
   0xa   :  { %s626_s29 = smov [#allocation2]   ;;  %s49_s12 = sshll.u32 %s720_s2, 4  ;;  %s50_s12 = int_to_ptr.hbm [resolvable:$true] %s49_s12 }
   0xb   :  { %s27_s30 = sshll.u32 %s626_s29, 4  ;;  %s627_s13 = smov [#allocation7]   ;;  %s28_s30 = int_to_ptr.vmem [resolvable:$true] %s27_s30 }
   0xc   :  { %30 = dma.hbm_to_vmem [thread:$0]  %s26_s28, 128, %s28_s30, [#allocation3]  }
   0xd   :  { %s51_s14 = sshll.u32 %s627_s13, 4  ;;  %s72_s17 = sshll.u32 %s722_s4, 4  ;;  %s52_s14 = int_to_ptr.vmem [resolvable:$true] %s51_s14  ;;  %s73_s17 = int_to_ptr.hbm [resolvable:$true] %s72_s17 }
   0xe   :  { %54 = dma.hbm_to_vmem [thread:$0]  %s50_s12, 32, %s52_s14, [#allocation6]  }
   0xf   :  { %s92_s19 = sshll.u32 %s726_s8, 4  ;;  %s628_s20 = smov [#allocation10]   ;;  %s93_s19 = int_to_ptr.vmem [resolvable:$true] %s92_s19 }
  0x10   :  { %s74_s21 = sshll.u32 %s628_s20, 4  ;;  %s629_s2 = smov [#allocation11]   ;;  %s75_s21 = int_to_ptr.vmem [resolvable:$true] %s74_s21 }
  0x11   :  { %80 = dma.hbm_to_vmem [thread:$0]  %s73_s17, 1024, %s75_s21, [#allocation9], %s624_s25, %s624_s25, %s625_s26  }
  0x12   :  { %95 = dma.vmem_to_smem %s93_s19, 16, %s629_s2, [#allocation4]  }
  0x13   :  { %612 = dma.done.wait [#allocation3], 128  }
  0x14   :  { %613 = vsyncadd [#allocation3], 4294967168 }
  0x15   :  { %614 = dma.done.wait [#allocation6], 288  }
  0x16   :  { %615 = vsyncadd [#allocation6], 4294967008 }
  0x17   :  { %616 = dma.done.wait [#allocation9], 2048  }
  0x18   :  { %617 = vsyncadd [#allocation9], 4294965248 }
  0x19   :  { %618 = dma.done.wait [#allocation4], 16  }
  0x1a   :  { %619 = vsyncadd [#allocation4], 4294967280 }
  0x1b   :  { %120 = sfence }
  0x1c   :  { %v377_v0 = vld [vmem:[#allocation5] sm:$0xf]  ;;  %v451_v1 = vld [vmem:[#allocation5 + $0x4] sm:$0x30]  ;;  %vm144_vm0 = vcmask 1045504   ;;  %v122_v2 = vld [vmem:[#allocation2] sm:$0xff] }
  0x1d   :  { %v378_v3 = vor.u32 %v451_v1, %v377_v0  ;;  %v450_v4 = vld [vmem:[#allocation5 + $0x4] sm:$0xf]  ;;  %v379_v5 = vld [vmem:[#allocation5 + $0x8] sm:$0x30]  ;;  %v123_v10 = vpack.c.bf16 %v122_v2, %v122_v2  ;;  %vm140_vm1 = vcmask 97280   ;;  %v457_v14 = vld [vmem:[#allocation8 + $0x28] sm:$0xff] }
  0x1e   :  { %v459_v6 = vld [vmem:[#allocation8 + $0x38] sm:$0xff]  ;;  %v382_v7 = vor.u32 %v450_v4, %v379_v5  ;;  %v458_v11 = vld [vmem:[#allocation8 + $0x30] sm:$0xff]  ;;  %v465_v15 = vld [vmem:[#allocation10 + $0x28] sm:$0xff]  ;;  %vm353_vm2 = vcmask 7168  }
  0x1f   :  { %v467_v8 = vld [vmem:[#allocation10 + $0x38] sm:$0xff]  ;;  %v146_v9 = vsel %vm144_vm0, %v378_v3, 0  ;;  %249 = vmatpush.bf16.msra.mxu2 %v459_v6  ;;  %v466_v13 = vld [vmem:[#allocation10 + $0x30] sm:$0xff]  ;;  %v456_v16 = vld [vmem:[#allocation8 + $0x20] sm:$0xff] }
  0x20   :  { %158 = vmatpush.bf16.msra.mxu0 %v146_v9  ;;  %v149_v12 = vsel %vm144_vm0, %v382_v7, 0  ;;  %331 = vmatpush.bf16.msra.mxu3 %v467_v8  ;;  %v464_v17 = vld [vmem:[#allocation10 + $0x20] sm:$0xff]  ;;  %v455_v18 = vld [vmem:[#allocation8 + $0x18] sm:$0xff]  ;;  %v454_v20 = vld [vmem:[#allocation8 + $0x10] sm:$0xff] }
  0x21   :  { %171 = vmatpush.bf16.msra.mxu1 %v149_v12  ;;  %v463_v19 = vld [vmem:[#allocation10 + $0x18] sm:$0xff]  ;;  %v462_v21 = vld [vmem:[#allocation10 + $0x10] sm:$0xff]  ;;  %v453_v22 = vld [vmem:[#allocation8 + $0x8] sm:$0xff] }
  0x22   :  { %v461_v23 = vld [vmem:[#allocation10 + $0x8] sm:$0xff]  ;;  %v452_v24 = vld [vmem:[#allocation8] sm:$0xff]  ;;  %v126_v26 = vld [vmem:[#allocation7] sm:$0x3] }
  0x23   :  { %383 = vmatmul.msk.bf16.vlgmr.msra.gmra.mxu0 %vm140_vm1, %v123_v10  ;;  %250 = vmatpush.bf16.msra.mxu2 %v458_v11  ;;  %v460_v25 = vld [vmem:[#allocation10] sm:$0xff]  ;;  %v128_v27 = vperm.slane %v126_v26, 0  ;;  %v129_v28 = vperm.slane %v126_v26, 1 }
  0x24   :  { %384 = vmatmul.msk.bf16.vlgmr.msra.gmra.mxu1 %vm140_vm1, %v123_v10  ;;  %332 = vmatpush.bf16.msra.mxu3 %v466_v13  ;;  %v478_v39 = vld [vmem:[%s723_s5] ss:$0 sm:$0xff]  ;;  %s350_s5 = sld [smem:[#allocation11]] }
  0x25   :  { %v345_v40 = vld [vmem:[%s725_s7] sm:$0x3]  ;;  %s449_s7 = sld [smem:[#allocation11 + $0x1]] }
  0x26   :  { %v479_v41 = vld [vmem:[%s724_s6] ss:$0 sm:$0xff]  ;;  %v346_v45 = vperm.slane %v345_v40, 0  ;;  %v355_v50 = vperm.slane %v345_v40, 1 }
  0x27   :  { %251 = vmatpush.bf16.msra.mxu2 %v457_v14 }
  0x28   :  { %333 = vmatpush.bf16.msra.mxu3 %v465_v15 }
  0x2a   :  { %v351_v54 = vstv %s350_s5 }
  0x2b   :  { %252 = vmatpush.bf16.msra.mxu2 %v456_v16  ;;  %v360_v57 = vstv %s449_s7 }
  0x2c   :  { %334 = vmatpush.bf16.msra.mxu3 %v464_v17 }
  0x2f   :  { %253 = vmatpush.bf16.msra.mxu2 %v455_v18 }
  0x30   :  { %335 = vmatpush.bf16.msra.mxu3 %v463_v19 }
  0x33   :  { %254 = vmatpush.bf16.msra.mxu2 %v454_v20 }
  0x34   :  { %336 = vmatpush.bf16.msra.mxu3 %v462_v21 }
  0x37   :  { %255 = vmatpush.bf16.msra.mxu2 %v453_v22 }
  0x38   :  { %337 = vmatpush.bf16.msra.mxu3 %v461_v23 }
  0x3b   :  { %256 = vmatpush.bf16.msra.mxu2 %v452_v24 }
  0x3c   :  { %338 = vmatpush.bf16.msra.mxu3 %v460_v25 }
  0xa0   :  { %v160_v29 = vpop.f32.mrf.mxu0 }
  0xa1   :  { %v161_v30 = vadd.f32 %v160_v29, %v128_v27  ;;  %v173_v31 = vpop.f32.mrf.mxu1 }
  0xa2   :  { %v174_v32 = vadd.f32 %v173_v31, %v129_v28 }
  0xa3   :  { %v177_v33 = vmax.f32 %v161_v30, 0.0 }
  0xa4   :  { %v178_v34 = vmax.f32 %v174_v32, 0.0 }
  0xa5   :  { %v179_v35 = vpack.c.bf16 %v177_v33, %v177_v33 }
  0xa6   :  { %v180_v36 = vpack.c.bf16 %v178_v34, %v178_v34 }
  0xa7   :  { %257 = vmatmul.bf16.vlgmr.msra.gmra.mxu2 %v179_v35 }
  0xa8   :  { %339 = vmatmul.bf16.vlgmr.msra.gmra.mxu3 %v180_v36  ;;  %v162_v37 = vpop.f32.mrf.mxu0 }
  0xa9   :  { %v175_v38 = vpop.f32.mrf.mxu1 }
 0x12a   :  { %v258_v42 = vpop.f32.mrf.mxu2 }
 0x12b   :  { %v259_v43 = vadd.f32 %v478_v39, %v258_v42  ;;  %v340_v44 = vpop.f32.mrf.mxu3 }
 0x12c   :  { %v341_v47 = vadd.f32 %v479_v41, %v340_v44 }
 0x12d   :  { %v262_v46 = vmax.f32 %v259_v43, 0.0 }
 0x12e   :  { %v344_v49 = vmax.f32 %v341_v47, 0.0 }
 0x12f   :  { %v347_v48 = vmul.f32 %v346_v45, %v262_v46 }
 0x130   :  { %v356_v53 = vmul.f32 %v355_v50, %v344_v49 }
 0x131   :  { %348 = vadd.xlane.f32.xlu0 %v347_v48 }
 0x132   :  { %v260_v51 = vpop.f32.mrf.mxu2 }
 0x133   :  { %v342_v52 = vpop.f32.mrf.mxu3 }
 0x139   :  { %357 = vadd.xlane.f32.xlu0 %v356_v53 }
 0x1a4   :  { %v349_v55 = vpop.xlane.xlu0 %348 }
 0x1a5   :  { %v352_v56 = vadd.f32 %v351_v54, %v349_v55 }
 0x1a7   :  { %354 = vst.msk [vmem:[%s727_s9] sm:$0xff] %vm353_vm2, %v352_v56 }
 0x1ac   :  { %v358_v58 = vpop.xlane.xlu0 %357 }
 0x1ad   :  { %v361_v59 = vadd.f32 %v360_v57, %v358_v58 }
 0x1af   :  { %362 = vst.msk [vmem:[%s728_s10] sm:$0xff] %vm353_vm2, %v361_v59 }
 0x1b0   :  { %371 = vsyncpa [#allocation3], 1 }
 0x1b1   :  { %372 = vsyncpa [#allocation6], 1 }
 0x1b2   :  { %373 = vsyncpa [#allocation9], 1 }
 0x1b3   :  { %374 = vsyncpa [#allocation4], 1 }

</bundles_post_ra>
